<compile_context>
chip_gen: v7x
topology: tpu7x:2x2x1
jax: 0.10.0
libtpu: 0.0.40
codegen_flags: <defaults>
</compile_context>

<pallas_src>
import functools
import math

import jax
import jax.numpy as jnp
from jax.experimental import pallas as pl
from jax.experimental.pallas import tpu as pltpu


def _round_up(x: int, m: int) -> int:
    return (x + m - 1) // m * m


# --------------------------------------------------------------------------
# Kernel
# --------------------------------------------------------------------------
def _shared_network_kernel(x_ref, w1_ref, w2_ref, wh_ref, b_ref, out_ref, *,
                           action_dim, approx_recip):
    """Fused trunk + both heads + masked softmax for one batch tile.

    x_ref : (TB, S)      raw f32 state tile (cast in-kernel)
    w1_ref: (S, H)       layer-1 weight (compute dtype)
    w2_ref: (H, H2)      layer-2 weight
    wh_ref: (H2, HP)     fused head, zero-padded to HP (=128) columns:
                         cols [0,A) actor, col A critic, rest zeros
    b_ref : (3, PADW)    f32 bias slab: row0=b1, row1=b2, row2=head bias
    out_ref: (TB, HP)    cols [0,A) softmax probs, col A value, rest garbage
    """
    dt = w1_ref.dtype
    h1_w = w1_ref.shape[1]
    h2_w = w2_ref.shape[1]
    hp_w = wh_ref.shape[1]

    b1 = b_ref[0:1, :h1_w]          # (1, H)  f32
    b2 = b_ref[1:2, :h2_w]          # (1, H2) f32
    bh = b_ref[2:3, :hp_w]          # (1, HP) f32

    x = x_ref[...].astype(dt)       # in-kernel cast (no HBM round trip)

    # Layer 1: MXU matmul with f32 accumulation, bias add + ReLU on VPU.
    h1 = jnp.maximum(
        jnp.dot(x, w1_ref[...], preferred_element_type=jnp.float32) + b1, 0.0)
    h1 = h1.astype(dt)              # bf16 recast on the perf path

    # Layer 2.
    h2 = jnp.maximum(
        jnp.dot(h1, w2_ref[...], preferred_element_type=jnp.float32) + b2, 0.0)
    h2 = h2.astype(dt)

    # Fused heads: one matmul -> [actor_logits | value | zero pad].
    head = jnp.dot(h2, wh_ref[...], preferred_element_type=jnp.float32) + bh

    # Numerically stable softmax over the first `action_dim` lanes only,
    # keeping one lane-dense output slab (unmasked stores).
    col = jax.lax.broadcasted_iota(jnp.int32, head.shape, 1)
    is_logit = col < action_dim
    m = jnp.max(jnp.where(is_logit, head, -jnp.inf), axis=-1, keepdims=True)
    shifted = jnp.where(is_logit, head - m, 0.0)
    e = jnp.where(is_logit, jnp.exp(shifted), 0.0)
    denom = jnp.sum(e, axis=-1, keepdims=True)
    probs = e * pl.reciprocal(denom, approx=approx_recip)

    out_ref[...] = jnp.where(is_logit, probs, head).astype(out_ref.dtype)


# --------------------------------------------------------------------------
# Parameter packing (once, outside the hot path)
# --------------------------------------------------------------------------
def pack_params(params, dtype=jnp.bfloat16, head_pad=128):
    """Cast weights, fuse+pad heads to a lane-dense width, pack biases (f32)."""
    w1 = params["w1"].astype(dtype)                       # (S, H)
    w2 = params["w2"].astype(dtype)                       # (H, H2)
    wa, wc = params["wa"], params["wc"]                   # (H2, A), (H2, 1)
    h2_dim, action_dim = wa.shape
    hp = max(head_pad, _round_up(action_dim + 1, 128))

    wh = jnp.zeros((h2_dim, hp), jnp.float32)
    wh = wh.at[:, :action_dim].set(wa)
    wh = wh.at[:, action_dim:action_dim + 1].set(wc)
    wh = wh.astype(dtype)                                 # (H2, HP)

    h1_dim = w1.shape[1]
    padw = max(_round_up(h1_dim, 128), _round_up(h2_dim, 128), hp)
    bslab = jnp.zeros((3, padw), jnp.float32)
    bslab = bslab.at[0, :h1_dim].set(params["b1"][0])
    bslab = bslab.at[1, :w2.shape[1]].set(params["b2"][0])
    bslab = bslab.at[2, :action_dim].set(params["ba"][0])
    bslab = bslab.at[2, action_dim].set(params["bc"][0, 0])
    return w1, w2, wh, bslab


# --------------------------------------------------------------------------
# Wrapper: pad-and-grid over the batch, weights/biases resident
# --------------------------------------------------------------------------
def shared_network_forward(state, packed, action_dim, *, tile_b=512):
    """state: (B, S) f32.  packed: pack_params output.  Returns (probs, value)."""
    w1, w2, wh, bslab = packed
    compute_dtype = w1.dtype
    approx_recip = bool(compute_dtype == jnp.bfloat16)

    B, S = state.shape
    HP = wh.shape[1]                              # padded head width (128)

    # Tile size: big tiles (fewer grid steps) for large B, sublane-rounded B
    # for tiny batches.  Pad B up to a tile multiple so we always grid.
    tb = tile_b if B >= tile_b else max(8, _round_up(B, 8))
    b_pad = _round_up(B, tb)
    state_p = state if b_pad == B else jnp.pad(state, ((0, b_pad - B), (0, 0)))

    kernel = functools.partial(_shared_network_kernel,
                               action_dim=action_dim,
                               approx_recip=approx_recip)

    out = pl.pallas_call(
        kernel,
        out_shape=jax.ShapeDtypeStruct((b_pad, HP), jnp.float32),
        grid=(b_pad // tb,),
        in_specs=[
            pl.BlockSpec((tb, S), lambda b: (b, 0)),          # streamed batch
            pl.BlockSpec(w1.shape, lambda b: (0, 0)),         # resident
            pl.BlockSpec(w2.shape, lambda b: (0, 0)),         # resident
            pl.BlockSpec(wh.shape, lambda b: (0, 0)),         # resident
            pl.BlockSpec(bslab.shape, lambda b: (0, 0)),      # resident biases
        ],
        out_specs=pl.BlockSpec((tb, HP), lambda b: (b, 0)),
        compiler_params=pltpu.CompilerParams(
            dimension_semantics=("parallel",)),               # megacore on v7x
    )(state_p, w1, w2, wh, bslab)

    probs = out[:B, :action_dim]
    value = out[:B, action_dim:action_dim + 1]
    return probs, value


# --------------------------------------------------------------------------
# Init + pure-JAX reference (matches the PyTorch module)
# --------------------------------------------------------------------------
def init_params(key, state_dim, action_dim, hidden_dim=128):
    """nn.Linear-style init U(-1/sqrt(fan_in), 1/sqrt(fan_in)); weights (in,out)."""
    h2 = hidden_dim // 2
    dims = [
        ("w1", (state_dim, hidden_dim)), ("b1", (1, hidden_dim)),
        ("w2", (hidden_dim, h2)),        ("b2", (1, h2)),
        ("wa", (h2, action_dim)),        ("ba", (1, action_dim)),
        ("wc", (h2, 1)),                 ("bc", (1, 1)),
    ]
    fan_in = {"w1": state_dim, "b1": state_dim,
              "w2": hidden_dim, "b2": hidden_dim,
              "wa": h2, "ba": h2, "wc": h2, "bc": h2}
    params = {}
    keys = jax.random.split(key, len(dims))
    for k, (name, shape) in zip(keys, dims):
        bound = 1.0 / math.sqrt(fan_in[name])
        params[name] = jax.random.uniform(k, shape, jnp.float32, -bound, bound)
    return params


def reference_forward(state, params):
    h1 = jnp.maximum(state @ params["w1"] + params["b1"], 0.0)
    h2 = jnp.maximum(h1 @ params["w2"] + params["b2"], 0.0)
    logits = h2 @ params["wa"] + params["ba"]
    probs = jax.nn.softmax(logits, axis=-1)
    value = h2 @ params["wc"] + params["bc"]
    return probs, value


if __name__ == "__main__":
    key = jax.random.PRNGKey(0)
    k_params, k_state, k_big, k_odd = jax.random.split(key, 4)

    B, STATE_DIM, ACTION_DIM, HIDDEN_DIM = 8, 16, 4, 32
    params = init_params(k_params, STATE_DIM, ACTION_DIM, HIDDEN_DIM)
    state = jax.random.normal(k_state, (B, STATE_DIM), jnp.float32)
    ref_probs, ref_value = reference_forward(state, params)

    # 1) Strict-accuracy path: f32 MXU operands, exact reciprocal.
    packed_f32 = pack_params(params, dtype=jnp.float32)
    probs, value = shared_network_forward(state, packed_f32, ACTION_DIM)
    jax.block_until_ready((probs, value))
    assert probs.shape == (B, ACTION_DIM) and value.shape == (B, 1)
    assert jnp.allclose(probs, ref_probs, atol=1e-4, rtol=1e-4)
    assert jnp.allclose(value, ref_value, atol=1e-4, rtol=1e-4)
    assert jnp.allclose(jnp.sum(probs, axis=-1), 1.0, atol=1e-4)

    # 2) Perf path: bf16 MXU operands (f32 accumulation), approx reciprocal.
    packed_bf16 = pack_params(params, dtype=jnp.bfloat16)
    probs_bf, value_bf = shared_network_forward(state, packed_bf16, ACTION_DIM)
    jax.block_until_ready((probs_bf, value_bf))
    assert jnp.allclose(probs_bf, ref_probs, atol=3e-2, rtol=3e-2)
    assert jnp.allclose(value_bf, ref_value, atol=3e-2, rtol=3e-2)
    assert jnp.allclose(jnp.sum(probs_bf, axis=-1), 1.0, atol=1e-2)

    # 3) Big divisible batch: 2 parallel grid steps (both TCs on v7x).
    BIG_B = 1024
    big_state = jax.random.normal(k_big, (BIG_B, STATE_DIM), jnp.float32)
    big_probs, big_value = shared_network_forward(
        big_state, packed_bf16, ACTION_DIM, tile_b=512)
    jax.block_until_ready((big_probs, big_value))
    ref_bp, ref_bv = reference_forward(big_state, params)
    assert big_probs.shape == (BIG_B, ACTION_DIM) and big_value.shape == (BIG_B, 1)
    assert jnp.allclose(big_probs, ref_bp, atol=3e-2, rtol=3e-2)
    assert jnp.allclose(big_value, ref_bv, atol=3e-2, rtol=3e-2)

    # 4) Large non-divisible batch: exercises the pad-and-grid path.
    ODD_B = 600
    odd_state = jax.random.normal(k_odd, (ODD_B, STATE_DIM), jnp.float32)
    odd_probs, odd_value = shared_network_forward(
        odd_state, packed_bf16, ACTION_DIM, tile_b=256)
    jax.block_until_ready((odd_probs, odd_value))
    ref_op, ref_ov = reference_forward(odd_state, params)
    assert odd_probs.shape == (ODD_B, ACTION_DIM) and odd_value.shape == (ODD_B, 1)
    assert jnp.allclose(odd_probs, ref_op, atol=3e-2, rtol=3e-2)
    assert jnp.allclose(odd_value, ref_ov, atol=3e-2, rtol=3e-2)

    print("KERNEL_OK")
</pallas_src>

<mosaic_0001>
module attributes {stable_mosaic.version = 11 : i64} {
  func.func @_shared_network_kernel(%arg0: i32, %arg1: memref<8x16xf32, #tpu.memory_space<vmem>>, %arg2: memref<16x32xf32, #tpu.memory_space<vmem>>, %arg3: memref<32x16xf32, #tpu.memory_space<vmem>>, %arg4: memref<16x128xf32, #tpu.memory_space<vmem>>, %arg5: memref<3x128xf32, #tpu.memory_space<vmem>>, %arg6: memref<8x128xf32, #tpu.memory_space<vmem>>) attributes {dimension_semantics = [#tpu.dimension_semantics<parallel>], iteration_bounds = array<i64: 1>, scalar_prefetch = 0 : i64, scratch_operands = 0 : i64, tpu.core_type = #tpu.core_type<tc>, window_params = [{transform_indices = @transform_0, window_bounds = array<i64: 8, 16>}, {pipeline_mode = #tpu.pipeline_mode<synchronous>, transform_indices = @transform_1, window_bounds = array<i64: 16, 32>}, {pipeline_mode = #tpu.pipeline_mode<synchronous>, transform_indices = @transform_2, window_bounds = array<i64: 32, 16>}, {pipeline_mode = #tpu.pipeline_mode<synchronous>, transform_indices = @transform_3, window_bounds = array<i64: 16, 128>}, {pipeline_mode = #tpu.pipeline_mode<synchronous>, transform_indices = @transform_4, window_bounds = array<i64: 3, 128>}, {transform_indices = @transform_5, window_bounds = array<i64: 8, 128>}]} {
    %c0 = arith.constant 0 : index
    %c0_0 = arith.constant 0 : index
    %0 = vector.load %arg5[%c0, %c0_0] : memref<3x128xf32, #tpu.memory_space<vmem>>, vector<1x32xf32>
    %c1 = arith.constant 1 : index
    %c0_1 = arith.constant 0 : index
    %1 = vector.load %arg5[%c1, %c0_1] : memref<3x128xf32, #tpu.memory_space<vmem>>, vector<1x16xf32>
    %c2 = arith.constant 2 : index
    %c0_2 = arith.constant 0 : index
    %2 = vector.load %arg5[%c2, %c0_2] : memref<3x128xf32, #tpu.memory_space<vmem>>, vector<1x128xf32>
    %c0_3 = arith.constant 0 : index
    %c0_4 = arith.constant 0 : index
    %3 = vector.load %arg1[%c0_3, %c0_4] : memref<8x16xf32, #tpu.memory_space<vmem>>, vector<8x16xf32>
    %c0_5 = arith.constant 0 : index
    %c0_6 = arith.constant 0 : index
    %4 = vector.load %arg2[%c0_5, %c0_6] : memref<16x32xf32, #tpu.memory_space<vmem>>, vector<16x32xf32>
    %cst = arith.constant dense<0.000000e+00> : vector<8x32xf32>
    %5 = tpu.matmul %3, %4, %cst {dimension_numbers = #tpu.dot_dimension_numbers<[1], [0], [0], [1], [0, 0, 1, 1], [], []>} : vector<8x16xf32>, vector<16x32xf32>, vector<8x32xf32> -> vector<8x32xf32>
    %6 = vector.broadcast %0 : vector<1x32xf32> to vector<8x32xf32>
    %7 = arith.addf %5, %6 : vector<8x32xf32>
    %cst_7 = arith.constant 0.000000e+00 : f32
    %8 = vector.broadcast %cst_7 : f32 to vector<8x32xf32>
    %9 = arith.maximumf %7, %8 : vector<8x32xf32>
    %c0_8 = arith.constant 0 : index
    %c0_9 = arith.constant 0 : index
    %10 = vector.load %arg3[%c0_8, %c0_9] : memref<32x16xf32, #tpu.memory_space<vmem>>, vector<32x16xf32>
    %cst_10 = arith.constant dense<0.000000e+00> : vector<8x16xf32>
    %11 = tpu.matmul %9, %10, %cst_10 {dimension_numbers = #tpu.dot_dimension_numbers<[1], [0], [0], [1], [0, 0, 1, 1], [], []>} : vector<8x32xf32>, vector<32x16xf32>, vector<8x16xf32> -> vector<8x16xf32>
    %12 = vector.broadcast %1 : vector<1x16xf32> to vector<8x16xf32>
    %13 = arith.addf %11, %12 : vector<8x16xf32>
    %cst_11 = arith.constant 0.000000e+00 : f32
    %14 = vector.broadcast %cst_11 : f32 to vector<8x16xf32>
    %15 = arith.maximumf %13, %14 : vector<8x16xf32>
    %c0_12 = arith.constant 0 : index
    %c0_13 = arith.constant 0 : index
    %16 = vector.load %arg4[%c0_12, %c0_13] : memref<16x128xf32, #tpu.memory_space<vmem>>, vector<16x128xf32>
    %cst_14 = arith.constant dense<0.000000e+00> : vector<8x128xf32>
    %17 = tpu.matmul %15, %16, %cst_14 {dimension_numbers = #tpu.dot_dimension_numbers<[1], [0], [0], [1], [0, 0, 1, 1], [], []>} : vector<8x16xf32>, vector<16x128xf32>, vector<8x128xf32> -> vector<8x128xf32>
    %18 = vector.broadcast %2 : vector<1x128xf32> to vector<8x128xf32>
    %19 = arith.addf %17, %18 : vector<8x128xf32>
    %20 = tpu.iota {dimensions = array<i32: 1>} : vector<8x128xi32>
    %c4_i32 = arith.constant 4 : i32
    %21 = vector.broadcast %c4_i32 : i32 to vector<8x128xi32>
    %22 = arith.cmpi slt, %20, %21 : vector<8x128xi32>
    %cst_15 = arith.constant 0xFF800000 : f32
    %23 = vector.broadcast %cst_15 : f32 to vector<8x128xf32>
    %24 = arith.select %22, %19, %23 : vector<8x128xi1>, vector<8x128xf32>
    %cst_16 = arith.constant dense<0xFF800000> : vector<8xf32>
    %25 = vector.multi_reduction <maximumf>, %24, %cst_16 [1] : vector<8x128xf32> to vector<8xf32>
    %26 = vector.shape_cast %25 : vector<8xf32> to vector<8x1xf32>
    %27 = vector.broadcast %26 : vector<8x1xf32> to vector<8x128xf32>
    %28 = arith.subf %19, %27 : vector<8x128xf32>
    %cst_17 = arith.constant 0.000000e+00 : f32
    %29 = vector.broadcast %cst_17 : f32 to vector<8x128xf32>
    %30 = arith.select %22, %28, %29 : vector<8x128xi1>, vector<8x128xf32>
    %31 = math.exp %30 : vector<8x128xf32>
    %cst_18 = arith.constant 0.000000e+00 : f32
    %32 = vector.broadcast %cst_18 : f32 to vector<8x128xf32>
    %33 = arith.select %22, %31, %32 : vector<8x128xi1>, vector<8x128xf32>
    %cst_19 = arith.constant dense<0.000000e+00> : vector<8xf32>
    %34 = vector.multi_reduction <add>, %33, %cst_19 [1] : vector<8x128xf32> to vector<8xf32>
    %35 = vector.shape_cast %34 : vector<8xf32> to vector<8x1xf32>
    %36 = tpu.reciprocal %35 : vector<8x1xf32> -> vector<8x1xf32>
    %37 = vector.broadcast %36 : vector<8x1xf32> to vector<8x128xf32>
    %38 = arith.mulf %33, %37 : vector<8x128xf32>
    %39 = arith.select %22, %38, %19 : vector<8x128xi1>, vector<8x128xf32>
    %c0_20 = arith.constant 0 : index
    %c0_21 = arith.constant 0 : index
    %40 = vector.load %arg6[%c0_20, %c0_21] : memref<8x128xf32, #tpu.memory_space<vmem>>, vector<8x128xf32>
    tpu.vector_store %arg6[%c0_20, %c0_21], %39 {strides = array<i32>} : memref<8x128xf32, #tpu.memory_space<vmem>>, vector<8x128xf32>,
    return
  }
  func.func @transform_0(%arg0: i32) -> (i32, i32) {
    %c0_i32 = arith.constant 0 : i32
    %c0_i32_0 = arith.constant 0 : i32
    return %arg0, %c0_i32 : i32, i32
  }
  func.func @transform_1(%arg0: i32) -> (i32, i32) {
    %c0_i32 = arith.constant 0 : i32
    %c0_i32_0 = arith.constant 0 : i32
    %c0_i32_1 = arith.constant 0 : i32
    return %c0_i32, %c0_i32_0 : i32, i32
  }
  func.func @transform_2(%arg0: i32) -> (i32, i32) {
    %c0_i32 = arith.constant 0 : i32
    %c0_i32_0 = arith.constant 0 : i32
    %c0_i32_1 = arith.constant 0 : i32
    return %c0_i32, %c0_i32_0 : i32, i32
  }
  func.func @transform_3(%arg0: i32) -> (i32, i32) {
    %c0_i32 = arith.constant 0 : i32
    %c0_i32_0 = arith.constant 0 : i32
    %c0_i32_1 = arith.constant 0 : i32
    return %c0_i32, %c0_i32_0 : i32, i32
  }
  func.func @transform_4(%arg0: i32) -> (i32, i32) {
    %c0_i32 = arith.constant 0 : i32
    %c0_i32_0 = arith.constant 0 : i32
    %c0_i32_1 = arith.constant 0 : i32
    return %c0_i32, %c0_i32_0 : i32, i32
  }
  func.func @transform_5(%arg0: i32) -> (i32, i32) {
    %c0_i32 = arith.constant 0 : i32
    %c0_i32_0 = arith.constant 0 : i32
    return %arg0, %c0_i32 : i32, i32
  }
}

</mosaic_0001>

<bundles_post_ra>
// kernel: tpu_custom_call.1
= control target key start
LH: loop header
LB: loop body
LE: loop exit
PB: predicated region body
PF: predicated region fallthrough
CT: control target
= control target key end

     0   :  { %v385_v2 = vmov 0.0|0.0   ;;  %vm386_vm0 = vmmov 0   ;;  %v387_v4 = vmov 0.0   ;;  %s476_s0 = inlined_call_operand.vmem [shape: f32[8,16], index: 0, kind: input, shape index: {}]   ;;  %s477_s1 = inlined_call_operand.vmem [shape: f32[16,32], index: 1, kind: input, shape index: {}]   ;;  %s478_s2 = inlined_call_operand.vmem [shape: f32[32,16], index: 2, kind: input, shape index: {}]   ;;  %s479_s3 = inlined_call_operand.vmem [shape: f32[16,128], index: 3, kind: input, shape index: {}]   ;;  %s480_s4 = inlined_call_operand.vmem [shape: f32[3,128], index: 4, kind: input, shape index: {}]   ;;  %s481_s5 = inlined_call_operand.hbm [shape: f32[8,128], index: 5, kind: output, shape index: {}]  }
   0x1   :  { %v25_v0 = vld [vmem:[%s477_s1] sm:$0xff]  ;;  %v26_v1 = vld [vmem:[%s477_s1 + $0x8] sm:$0xff]  ;;  %341 = vmatprep.subr.bf16.mxu0 %v385_v2  ;;  %320 = vmatprep.mubr.msk.f32.mxu0 %vm386_vm0, %v387_v4 }
   0x2   :  { %v342_v3 = vpack.c.bf16 %v26_v1, %v25_v0  ;;  %v106_v5 = vld [vmem:[%s478_s2] sm:$0xff]  ;;  %v107_v6 = vld [vmem:[%s478_s2 + $0x8] sm:$0xff]  ;;  %344 = vmatprep.subr.bf16.mxu1 %v385_v2  ;;  %331 = vmatprep.mubr.msk.f32.mxu1 %vm386_vm0, %v387_v4 }
   0x3   :  { %v345_v7 = vpack.c.bf16 %v107_v6, %v106_v5 }
   0x4   :  { %10 = vsyncpa [#allocation3], 0  ;;  %343 = vmatpush3.bf16.msra.mxu0 %v342_v3  ;;  %v24_v8 = vld [vmem:[%s476_s0] sm:$0xff]  ;;  %vm31_vm1 = vcmask 130048   ;;  %v108_v9 = vld [vmem:[%s478_s2 + $0x10] sm:$0xff]  ;;  %vm114_vm2 = vcmask 261120   ;;  %v268_v25 = vlaneseq }
   0x5   :  { %346 = vmatpush3.bf16.msra.mxu1 %v345_v7  ;;  %350 = vmatprep.subr.bf16.mxu0 %v385_v2  ;;  %v109_v10 = vld [vmem:[%s478_s2 + $0x18] sm:$0xff]  ;;  %v299_v12 = vld [vmem:[%s480_s4] ss:$0 sm:$0xff]  ;;  %v190_v18 = vld [vmem:[%s479_s3 + $0x8] sm:$0xff] }
   0x6   :  { %347 = vmatprep.subr.bf16.mxu1 %v385_v2  ;;  %v348_v11 = vpack.c.bf16 %v109_v10, %v108_v9  ;;  %v189_v17 = vld [vmem:[%s479_s3] sm:$0xff]  ;;  %v269_v26 = vand.u32 127, %v268_v25  ;;  %s388_s3 = smov [#allocation2]  }
   0x7   :  { %321 = vmatmul.mubr.msk.f32.vlgmr.msra.gmra.mrb[0].mxu0 %vm31_vm1, %v24_v8  ;;  %v351_v19 = vpack.c.bf16 %v190_v18, %v189_v17  ;;  %v301_v20 = vld [vmem:[%s480_s4 + $0x1] ss:$0 sm:$0xff]  ;;  %v303_v27 = vld [vmem:[%s480_s4 + $0x2] ss:$0 sm:$0xff]  ;;  %s291_s4 = sshll.u32 %s388_s3, 4  ;;  %s292_s4 = int_to_ptr.vmem [resolvable:$true] %s291_s4 }
   0x8   :  { %338 = vmatprep.mubr.msk.f32.mxu0 %vm386_vm0, %v387_v4  ;;  %vm270_vm3 = vcmp.lt.s32.totalorder %v269_v26, 4  ;;  %s361_s14 = scalar_lea.vmem %s292_s4, 128  ;;  %p366_p1 = scmp.lt.s32.totalorder %s292_s4, %s292_s4 }
   0x9   :  { %349 = vmatpush3.bf16.msra.mxu1 %v348_v11  ;;  %352 = vmatpush3.bf16.msra.mxu0 %v351_v19  ;;  %p362_p0 = scmp.ne.s32.totalorder %s292_s4, %s361_s14  ;;  %p367_p2 = scmp.lt.s32.totalorder %s361_s14, %s361_s14 }
   0xb   :  { %p368_p3 = por %p367_p2, %p366_p1 }
   0xd   :  { %p369_p4 = pnand %p368_p3, %p362_p0 }
  0xda   :  { %v101_v13 = vpop.f32.mrb[0].mxu0 }
  0xdb   :  { %v102_v14 = vadd.f32 %v299_v12, %v101_v13  ;;  %v322_v15 = vpop.f32.mrb[1].mxu0 }
  0xdd   :  { %v105_v16 = vmax.f32 %v102_v14, 0.0 }
  0xdf   :  { %332 = vmatmul.mubr.msk.f32.vlgmr.msra.gmra.mrb[0].mxu1 %vm114_vm2, %v105_v16 }
 0x1b2   :  { %v184_v21 = vpop.f32.mrb[0].mxu1 }
 0x1b3   :  { %v185_v22 = vadd.f32 %v301_v20, %v184_v21  ;;  %v333_v23 = vpop.f32.mrb[1].mxu1 }
 0x1b5   :  { %v188_v24 = vmax.f32 %v185_v22, 0.0 }
 0x1b7   :  { %339 = vmatmul.mubr.msk.f32.vlgmr.msra.gmra.mrb[2].mxu0 %vm31_vm1, %v188_v24 }
 0x28a   :  { %v264_v28 = vpop.f32.mrb[2].mxu0 }
 0x28b   :  { %v265_v29 = vadd.f32 %v303_v27, %v264_v28  ;;  %v340_v30 = vpop.f32.mrb[3].mxu0 }
 0x28d   :  { %v271_v31 = vsel %vm270_vm3, %v265_v29, -inf }
 0x28e   :  { %272 = vmax.xlane.f32.xlu0 %v271_v31 }
 0x31b   :  { %v273_v32 = vpop.xlane.xlu0 %272 }
 0x31c   :  { %v274_v33 = vsub.f32 %v265_v29, %v273_v32 }
 0x31e   :  { %v275_v34 = vsel %vm270_vm3, %v274_v33, 0.0 }
 0x31f   :  { %v276_v35 = vmul.f32 1.442695, %v275_v34 }
 0x321   :  { %357 = vpow2.f32 %v276_v35 }
 0x32b   :  { %v358_v36 = vpop.eup %357 }
 0x32c   :  { %v278_v37 = vsel %vm270_vm3, %v358_v36, 0.0 }
 0x32d   :  { %279 = vadd.xlane.f32.xlu0 %v278_v37 }
 0x3ba   :  { %v280_v38 = vpop.xlane.xlu0 %279 }
 0x3bb   :  { %359 = vrcp.f32 %v280_v38 }
 0x3c5   :  { %v360_v39 = vpop.eup %359 }
 0x3c6   :  { %v282_v40 = vmul.f32 %v360_v39, %v278_v37 }
 0x3c8   :  { %v283_v41 = vsel %vm270_vm3, %v282_v40, %v265_v29 }
 0x3c9   :  { %284 = vst [vmem:[#allocation2] sm:$0xff] %v283_v41 }
 0x3ca   :  { %372 = shalt.err (!%p369_p4)
}
 0x3cb   :  { %s373_s17 = scalar_lea.hbm %s481_s5, 128 }
 0x3cc   :  { %p374_p5 = scmp.ne.s32.totalorder %s481_s5, %s373_s17  ;;  %p377_p6 = scmp.lt.u32.totalorder %s373_s17, %s481_s5 }
 0x3ce   :  { %p379_p7 = pnand %p377_p6, %p374_p5 }
 0x3d0   :  { %382 = shalt.err (!%p379_p7)
}
 0x3d1   :  { %294 = dma.vmem_to_hbm [thread:$0]  %s292_s4, 128, %s481_s5, [#allocation3]  }
 0x3d2   :  { %383 = dma.done.wait [#allocation3], 128  }
 0x3d3   :  { %384 = vsyncadd [#allocation3], 4294967168 }
 0x3d4   :  { %298 = vsyncpa [#allocation3], 1 }

</bundles_post_ra>
